<compile_context>
chip_gen: v7x
topology: tpu7x:2x2x1
jax: 0.10.0
libtpu: 0.0.40
codegen_flags: <defaults>
</compile_context>

<pallas_src>
import functools

import jax
import jax.numpy as jnp
from jax import lax
from jax.experimental import pallas as pl
from jax.experimental.pallas import tpu as pltpu

BN_EPS = 1e-5        # torch.nn.BatchNorm1d default eps
NUM_LOC = 252        # embedding table rows (torch.nn.Embedding(252, E))
NUM_LOC_PAD = 256    # lane-aligned (2 x 128) padded table rows
NEG_BIG = -1e30      # bias for padded logit lanes -> exp() underflows to 0


def _bn_relu(h, gamma, beta):
    """Training-mode BatchNorm1d (biased batch variance, one-pass stats) + ReLU."""
    mu = jnp.mean(h, axis=0, keepdims=True)
    var = jnp.maximum(jnp.mean(h * h, axis=0, keepdims=True) - mu * mu, 0.0)
    h = (h - mu) * lax.rsqrt(var + BN_EPS) * gamma + beta
    return jnp.maximum(h, 0.0)


def _discrete1_kernel(x_ref, embw1_ref, w1c_ref, w2_ref, w3_ref, pvec_ref,
                      probs_ref, loss_ref,
                      *, dim, n_feat, h1, h2, d_out, d_pad):
    x = x_ref[...]                                        # (B, F) f32
    batch = x.shape[0]

    # ---- in-kernel glue: targets, location id, continuous features ---------
    y = x[:, dim:dim + 1].astype(jnp.int32)               # (B, 1) class labels
    loc = x[:, n_feat - 1:n_feat].astype(jnp.int32)       # (B, 1) location ids
    # Label column is NOT sliced out: w1c has a zero row at index `dim`, so it
    # contributes exactly 0 to linear1 (no lane concat / XLU shifts).
    cont = x[:, :n_feat - 1]                               # (B, F-1)

    # ---- embedding lookup fused into linear1 --------------------------------
    # one-hot is exact in bf16 (values 0/1); the fused (256, H1) bf16 table is
    # emb @ W1[emb-rows], so this single matmul == gather + linear1 term.
    loc_oh = (lax.broadcasted_iota(jnp.int32, (batch, NUM_LOC_PAD), 1) == loc)

    # packed per-layer vectors: rows = [g1, be1, g2, be2, b3pad]
    g1 = pvec_ref[0:1, :h1]
    be1 = pvec_ref[1:2, :h1]
    g2 = pvec_ref[2:3, :h2]
    be2 = pvec_ref[3:4, :h2]
    b3 = pvec_ref[4:5, :d_pad]

    # ---- linear1 (bias cancelled by BN) + BN + relu --------------------------
    h = (jnp.dot(cont.astype(jnp.bfloat16), w1c_ref[...],
                 preferred_element_type=jnp.float32)
         + jnp.dot(loc_oh.astype(jnp.bfloat16), embw1_ref[...],
                   preferred_element_type=jnp.float32))
    h = _bn_relu(h, g1, be1)

    # ---- linear2 (bias cancelled by BN) + BN + relu --------------------------
    h = jnp.dot(h.astype(jnp.bfloat16), w2_ref[...],
                preferred_element_type=jnp.float32)
    h = _bn_relu(h, g2, be2)

    # ---- linear3 -> logits (lane-padded to d_pad, padded bias = -1e30) ------
    logits = jnp.dot(h.astype(jnp.bfloat16), w3_ref[...],
                     preferred_element_type=jnp.float32) + b3

    # ---- softmax (Categorical probs); padded lanes give exp()==0 ------------
    m = jnp.max(logits, axis=1, keepdims=True)
    z = logits - m
    ez = jnp.exp(z)
    denom = jnp.sum(ez, axis=1, keepdims=True)
    probs_ref[...] = ez * pl.reciprocal(denom, approx=True)   # lane-dense store

    # ---- cross-entropy loss (mean), target mask built in-kernel -------------
    log_sm = z - jnp.log(denom)
    tgt = lax.broadcasted_iota(jnp.int32, (batch, d_pad), 1) == y
    loss_ref[0, 0] = -jnp.sum(jnp.where(tgt, log_sm, 0.0)) / batch


def discrete1_forward(x, params, dim):
    """x: (B, F) float32 raw input.  Returns (probs (B, D_out), loss scalar)."""
    B, F = x.shape
    assert dim < F - 1, "last column must hold the location id (dim != F-1)"
    H1 = params["w1c"].shape[1]
    H2 = params["w2"].shape[1]
    D_pad = params["w3"].shape[1]               # lane-aligned (multiple of 128)
    D_out = int(params["d_out"])

    kernel = functools.partial(_discrete1_kernel, dim=dim, n_feat=F,
                               h1=H1, h2=H2, d_out=D_out, d_pad=D_pad)
    vmem = pl.BlockSpec(memory_space=pltpu.VMEM)

    # Size the VMEM limit from the actual buffers (+ intermediates headroom),
    # capped for v7x's 64 MiB physical VMEM.
    in_bytes = (x.nbytes + params["emb_w1"].nbytes + params["w1c"].nbytes
                + params["w2"].nbytes + params["w3"].nbytes
                + params["pvec"].nbytes)
    out_bytes = B * D_pad * 4 + 4
    vmem_limit = int(min(max(4 * (in_bytes + out_bytes) + (8 << 20), 16 << 20),
                         48 << 20))

    probs_pad, loss = pl.pallas_call(
        kernel,
        out_shape=(
            jax.ShapeDtypeStruct((B, D_pad), jnp.float32),   # lane-dense probs
            jax.ShapeDtypeStruct((1, 1), jnp.float32),
        ),
        in_specs=[vmem] * 6,
        out_specs=(vmem, pl.BlockSpec(memory_space=pltpu.SMEM)),
        compiler_params=pltpu.CompilerParams(vmem_limit_bytes=vmem_limit),
    )(x, params["emb_w1"], params["w1c"], params["w2"], params["w3"],
      params["pvec"])
    return probs_pad[:, :D_out], loss[0, 0]


def init_params(key, D_in, H1, H2, D_out, loc_embedding, dim, n_feat):
    """Deterministic init mimicking torch defaults (uniform +-1/sqrt(fan_in);
    BatchNorm weight=1, bias=0; Embedding ~ N(0,1)).  Weights stored bf16;
    linear1/linear2 biases dropped (exactly cancelled by training-mode BN);
    the embedding table is pre-fused with its slice of W1."""
    ks = jax.random.split(key, 4)

    def lin(k, fan_in, fan_out):
        bound = 1.0 / float(fan_in) ** 0.5
        kw, kb = jax.random.split(k)
        w = jax.random.uniform(kw, (fan_in, fan_out), jnp.float32, -bound, bound)
        b = jax.random.uniform(kb, (fan_out,), jnp.float32, -bound, bound)
        return w, b

    w1, _b1 = lin(ks[0], D_in, H1)      # b1 dropped (BN-invariant)
    w2, _b2 = lin(ks[1], H1, H2)        # b2 dropped (BN-invariant)
    w3, b3 = lin(ks[2], H2, D_out)
    emb = jax.random.normal(ks[3], (NUM_LOC, loc_embedding), jnp.float32)

    n_cont = D_in - loc_embedding       # continuous feature count = F - 2

    # --- w1c: (F-1, H1) with a zero row at index `dim` (label column) --------
    w1_cont = w1[:n_cont]                               # (F-2, H1)
    w1c = jnp.zeros((n_feat - 1, H1), jnp.float32)
    w1c = w1c.at[:dim].set(w1_cont[:dim])
    w1c = w1c.at[dim + 1:].set(w1_cont[dim:])

    # --- fused embedding * W1 table, lane-padded 252 -> 256 rows -------------
    emb_w1 = jnp.zeros((NUM_LOC_PAD, H1), jnp.float32)
    emb_w1 = emb_w1.at[:NUM_LOC].set(emb @ w1[n_cont:])  # (252, E) @ (E, H1)

    # --- w3 / b3 padded to a lane-aligned output width ------------------------
    D_pad = int(pl.cdiv(D_out, 128) * 128)
    w3_pad = jnp.zeros((H2, D_pad), jnp.float32).at[:, :D_out].set(w3)
    b3_pad = jnp.full((D_pad,), NEG_BIG, jnp.float32).at[:D_out].set(b3)

    # --- packed per-layer vectors: [g1, be1, g2, be2, b3pad] ------------------
    hmax = max(H1, H2, D_pad)

    def row(v):
        return jnp.zeros((hmax,), jnp.float32).at[:v.shape[0]].set(v)

    pvec = jnp.stack([row(jnp.ones((H1,), jnp.float32)),
                      row(jnp.zeros((H1,), jnp.float32)),
                      row(jnp.ones((H2,), jnp.float32)),
                      row(jnp.zeros((H2,), jnp.float32)),
                      row(b3_pad)], axis=0)              # (5, hmax) f32

    return dict(
        emb_w1=emb_w1.astype(jnp.bfloat16),              # (256, H1) fused table
        w1c=w1c.astype(jnp.bfloat16),                    # (F-1, H1), zero row @ dim
        w2=w2.astype(jnp.bfloat16),                      # (H1, H2)
        w3=w3_pad.astype(jnp.bfloat16),                  # (H2, D_pad)
        pvec=pvec,
        d_out=D_out,
    )


if __name__ == "__main__":
    # Small shapes consistent with the module:
    #   raw input x: (B, F); column `dim` holds class labels, last column holds
    #   the location id (int in [0, 252)); D_in = (F - 2) + loc_embedding.
    B, F = 8, 10
    dim = 0
    loc_embedding = 8
    D_in = (F - 2) + loc_embedding      # 16
    H1, H2, D_out = 32, 16, 8

    key = jax.random.PRNGKey(0)
    kx, kloc, ky, kp = jax.random.split(key, 4)

    x = jax.random.normal(kx, (B, F), jnp.float32)
    labels = jax.random.randint(ky, (B,), 0, D_out).astype(jnp.float32)
    locs = jax.random.randint(kloc, (B,), 0, NUM_LOC).astype(jnp.float32)
    x = x.at[:, dim].set(labels).at[:, F - 1].set(locs)

    params = init_params(kp, D_in, H1, H2, D_out, loc_embedding, dim, F)

    probs, loss = discrete1_forward(x, params, dim)
    jax.block_until_ready((probs, loss))
    # TODO(synk): torch.distributions.Categorical has no Pallas equivalent;
    # we return its defining parameters (the softmax probs) plus the CE loss.
    # BatchNorm running_mean/running_var buffers are not updated (forward only).
    print("KERNEL_OK")
</pallas_src>

<mosaic_0001>
module attributes {stable_mosaic.version = 11 : i64} {
  func.func @_discrete1_kernel(%arg0: memref<8x10xf32, #tpu.memory_space<vmem>>, %arg1: memref<256x32xbf16, #tpu.memory_space<vmem>>, %arg2: memref<9x32xbf16, #tpu.memory_space<vmem>>, %arg3: memref<32x16xbf16, #tpu.memory_space<vmem>>, %arg4: memref<16x128xbf16, #tpu.memory_space<vmem>>, %arg5: memref<5x128xf32, #tpu.memory_space<vmem>>, %arg6: memref<8x128xf32, #tpu.memory_space<vmem>>, %arg7: memref<1x1xf32, #tpu.memory_space<smem>>) attributes {dimension_semantics = [], scalar_prefetch = 0 : i64, scratch_operands = 0 : i64, tpu.core_type = #tpu.core_type<tc>} {
    %c0 = arith.constant 0 : index
    %c0_0 = arith.constant 0 : index
    %0 = vector.load %arg0[%c0, %c0_0] : memref<8x10xf32, #tpu.memory_space<vmem>>, vector<8x10xf32>
    %1 = vector.extract_strided_slice %0 {offsets = [0, 0], sizes = [8, 1], strides = [1, 1]} : vector<8x10xf32> to vector<8x1xf32>
    %2 = arith.fptosi %1 : vector<8x1xf32> to vector<8x1xi32>
    %3 = vector.extract_strided_slice %0 {offsets = [0, 9], sizes = [8, 1], strides = [1, 1]} : vector<8x10xf32> to vector<8x1xf32>
    %4 = arith.fptosi %3 : vector<8x1xf32> to vector<8x1xi32>
    %5 = vector.extract_strided_slice %0 {offsets = [0, 0], sizes = [8, 9], strides = [1, 1]} : vector<8x10xf32> to vector<8x9xf32>
    %6 = tpu.iota {dimensions = array<i32: 1>} : vector<8x256xi32>
    %7 = vector.broadcast %4 : vector<8x1xi32> to vector<8x256xi32>
    %8 = arith.cmpi eq, %6, %7 : vector<8x256xi32>
    %c0_1 = arith.constant 0 : index
    %c0_2 = arith.constant 0 : index
    %9 = vector.load %arg5[%c0_1, %c0_2] : memref<5x128xf32, #tpu.memory_space<vmem>>, vector<1x32xf32>
    %c1 = arith.constant 1 : index
    %c0_3 = arith.constant 0 : index
    %10 = vector.load %arg5[%c1, %c0_3] : memref<5x128xf32, #tpu.memory_space<vmem>>, vector<1x32xf32>
    %c2 = arith.constant 2 : index
    %c0_4 = arith.constant 0 : index
    %11 = vector.load %arg5[%c2, %c0_4] : memref<5x128xf32, #tpu.memory_space<vmem>>, vector<1x16xf32>
    %c3 = arith.constant 3 : index
    %c0_5 = arith.constant 0 : index
    %12 = vector.load %arg5[%c3, %c0_5] : memref<5x128xf32, #tpu.memory_space<vmem>>, vector<1x16xf32>
    %c4 = arith.constant 4 : index
    %c0_6 = arith.constant 0 : index
    %13 = vector.load %arg5[%c4, %c0_6] : memref<5x128xf32, #tpu.memory_space<vmem>>, vector<1x128xf32>
    %14 = arith.truncf %5 : vector<8x9xf32> to vector<8x9xbf16>
    %c0_7 = arith.constant 0 : index
    %c0_8 = arith.constant 0 : index
    %15 = vector.load %arg2[%c0_7, %c0_8] : memref<9x32xbf16, #tpu.memory_space<vmem>>, vector<9x32xbf16>
    %cst = arith.constant dense<0.000000e+00> : vector<8x32xf32>
    %16 = tpu.matmul %14, %15, %cst {dimension_numbers = #tpu.dot_dimension_numbers<[1], [0], [0], [1], [0, 0, 1, 1], [], []>} : vector<8x9xbf16>, vector<9x32xbf16>, vector<8x32xf32> -> vector<8x32xf32>
    %17 = arith.extui %8 : vector<8x256xi1> to vector<8x256xi32>
    %18 = arith.sitofp %17 : vector<8x256xi32> to vector<8x256xf32>
    %19 = arith.truncf %18 : vector<8x256xf32> to vector<8x256xbf16>
    %c0_9 = arith.constant 0 : index
    %c0_10 = arith.constant 0 : index
    %20 = vector.load %arg1[%c0_9, %c0_10] : memref<256x32xbf16, #tpu.memory_space<vmem>>, vector<256x32xbf16>
    %cst_11 = arith.constant dense<0.000000e+00> : vector<8x32xf32>
    %21 = tpu.matmul %19, %20, %cst_11 {dimension_numbers = #tpu.dot_dimension_numbers<[1], [0], [0], [1], [0, 0, 1, 1], [], []>} : vector<8x256xbf16>, vector<256x32xbf16>, vector<8x32xf32> -> vector<8x32xf32>
    %22 = arith.addf %16, %21 : vector<8x32xf32>
    %cst_12 = arith.constant dense<0.000000e+00> : vector<32xf32>
    %23 = vector.multi_reduction <add>, %22, %cst_12 [0] : vector<8x32xf32> to vector<32xf32>
    %24 = vector.shape_cast %23 : vector<32xf32> to vector<1x32xf32>
    %cst_13 = arith.constant 8.000000e+00 : f32
    %25 = vector.broadcast %cst_13 : f32 to vector<1x32xf32>
    %26 = arith.divf %24, %25 : vector<1x32xf32>
    %27 = arith.mulf %22, %22 : vector<8x32xf32>
    %cst_14 = arith.constant dense<0.000000e+00> : vector<32xf32>
    %28 = vector.multi_reduction <add>, %27, %cst_14 [0] : vector<8x32xf32> to vector<32xf32>
    %29 = vector.shape_cast %28 : vector<32xf32> to vector<1x32xf32>
    %cst_15 = arith.constant 8.000000e+00 : f32
    %30 = vector.broadcast %cst_15 : f32 to vector<1x32xf32>
    %31 = arith.divf %29, %30 : vector<1x32xf32>
    %32 = arith.mulf %26, %26 : vector<1x32xf32>
    %33 = arith.subf %31, %32 : vector<1x32xf32>
    %cst_16 = arith.constant 0.000000e+00 : f32
    %34 = vector.broadcast %cst_16 : f32 to vector<1x32xf32>
    %35 = arith.maximumf %33, %34 : vector<1x32xf32>
    %36 = vector.broadcast %26 : vector<1x32xf32> to vector<8x32xf32>
    %37 = arith.subf %22, %36 : vector<8x32xf32>
    %cst_17 = arith.constant 9.99999974E-6 : f32
    %38 = vector.broadcast %cst_17 : f32 to vector<1x32xf32>
    %39 = arith.addf %35, %38 : vector<1x32xf32>
    %40 = math.rsqrt %39 : vector<1x32xf32>
    %41 = vector.broadcast %40 : vector<1x32xf32> to vector<8x32xf32>
    %42 = arith.mulf %37, %41 : vector<8x32xf32>
    %43 = vector.broadcast %9 : vector<1x32xf32> to vector<8x32xf32>
    %44 = arith.mulf %42, %43 : vector<8x32xf32>
    %45 = vector.broadcast %10 : vector<1x32xf32> to vector<8x32xf32>
    %46 = arith.addf %44, %45 : vector<8x32xf32>
    %cst_18 = arith.constant 0.000000e+00 : f32
    %47 = vector.broadcast %cst_18 : f32 to vector<8x32xf32>
    %48 = arith.maximumf %46, %47 : vector<8x32xf32>
    %49 = arith.truncf %48 : vector<8x32xf32> to vector<8x32xbf16>
    %c0_19 = arith.constant 0 : index
    %c0_20 = arith.constant 0 : index
    %50 = vector.load %arg3[%c0_19, %c0_20] : memref<32x16xbf16, #tpu.memory_space<vmem>>, vector<32x16xbf16>
    %cst_21 = arith.constant dense<0.000000e+00> : vector<8x16xf32>
    %51 = tpu.matmul %49, %50, %cst_21 {dimension_numbers = #tpu.dot_dimension_numbers<[1], [0], [0], [1], [0, 0, 1, 1], [], []>} : vector<8x32xbf16>, vector<32x16xbf16>, vector<8x16xf32> -> vector<8x16xf32>
    %cst_22 = arith.constant dense<0.000000e+00> : vector<16xf32>
    %52 = vector.multi_reduction <add>, %51, %cst_22 [0] : vector<8x16xf32> to vector<16xf32>
    %53 = vector.shape_cast %52 : vector<16xf32> to vector<1x16xf32>
    %cst_23 = arith.constant 8.000000e+00 : f32
    %54 = vector.broadcast %cst_23 : f32 to vector<1x16xf32>
    %55 = arith.divf %53, %54 : vector<1x16xf32>
    %56 = arith.mulf %51, %51 : vector<8x16xf32>
    %cst_24 = arith.constant dense<0.000000e+00> : vector<16xf32>
    %57 = vector.multi_reduction <add>, %56, %cst_24 [0] : vector<8x16xf32> to vector<16xf32>
    %58 = vector.shape_cast %57 : vector<16xf32> to vector<1x16xf32>
    %cst_25 = arith.constant 8.000000e+00 : f32
    %59 = vector.broadcast %cst_25 : f32 to vector<1x16xf32>
    %60 = arith.divf %58, %59 : vector<1x16xf32>
    %61 = arith.mulf %55, %55 : vector<1x16xf32>
    %62 = arith.subf %60, %61 : vector<1x16xf32>
    %cst_26 = arith.constant 0.000000e+00 : f32
    %63 = vector.broadcast %cst_26 : f32 to vector<1x16xf32>
    %64 = arith.maximumf %62, %63 : vector<1x16xf32>
    %65 = vector.broadcast %55 : vector<1x16xf32> to vector<8x16xf32>
    %66 = arith.subf %51, %65 : vector<8x16xf32>
    %cst_27 = arith.constant 9.99999974E-6 : f32
    %67 = vector.broadcast %cst_27 : f32 to vector<1x16xf32>
    %68 = arith.addf %64, %67 : vector<1x16xf32>
    %69 = math.rsqrt %68 : vector<1x16xf32>
    %70 = vector.broadcast %69 : vector<1x16xf32> to vector<8x16xf32>
    %71 = arith.mulf %66, %70 : vector<8x16xf32>
    %72 = vector.broadcast %11 : vector<1x16xf32> to vector<8x16xf32>
    %73 = arith.mulf %71, %72 : vector<8x16xf32>
    %74 = vector.broadcast %12 : vector<1x16xf32> to vector<8x16xf32>
    %75 = arith.addf %73, %74 : vector<8x16xf32>
    %cst_28 = arith.constant 0.000000e+00 : f32
    %76 = vector.broadcast %cst_28 : f32 to vector<8x16xf32>
    %77 = arith.maximumf %75, %76 : vector<8x16xf32>
    %78 = arith.truncf %77 : vector<8x16xf32> to vector<8x16xbf16>
    %c0_29 = arith.constant 0 : index
    %c0_30 = arith.constant 0 : index
    %79 = vector.load %arg4[%c0_29, %c0_30] : memref<16x128xbf16, #tpu.memory_space<vmem>>, vector<16x128xbf16>
    %cst_31 = arith.constant dense<0.000000e+00> : vector<8x128xf32>
    %80 = tpu.matmul %78, %79, %cst_31 {dimension_numbers = #tpu.dot_dimension_numbers<[1], [0], [0], [1], [0, 0, 1, 1], [], []>} : vector<8x16xbf16>, vector<16x128xbf16>, vector<8x128xf32> -> vector<8x128xf32>
    %81 = vector.broadcast %13 : vector<1x128xf32> to vector<8x128xf32>
    %82 = arith.addf %80, %81 : vector<8x128xf32>
    %cst_32 = arith.constant dense<0xFF800000> : vector<8xf32>
    %83 = vector.multi_reduction <maximumf>, %82, %cst_32 [1] : vector<8x128xf32> to vector<8xf32>
    %84 = vector.shape_cast %83 : vector<8xf32> to vector<8x1xf32>
    %85 = vector.broadcast %84 : vector<8x1xf32> to vector<8x128xf32>
    %86 = arith.subf %82, %85 : vector<8x128xf32>
    %87 = math.exp %86 : vector<8x128xf32>
    %cst_33 = arith.constant dense<0.000000e+00> : vector<8xf32>
    %88 = vector.multi_reduction <add>, %87, %cst_33 [1] : vector<8x128xf32> to vector<8xf32>
    %89 = vector.shape_cast %88 : vector<8xf32> to vector<8x1xf32>
    %90 = tpu.reciprocal %89 {approx = true} : vector<8x1xf32> -> vector<8x1xf32>
    %91 = vector.broadcast %90 : vector<8x1xf32> to vector<8x128xf32>
    %92 = arith.mulf %87, %91 : vector<8x128xf32>
    %c0_34 = arith.constant 0 : index
    %c0_35 = arith.constant 0 : index
    %93 = vector.load %arg6[%c0_34, %c0_35] : memref<8x128xf32, #tpu.memory_space<vmem>>, vector<8x128xf32>
    tpu.vector_store %arg6[%c0_34, %c0_35], %92 {strides = array<i32>} : memref<8x128xf32, #tpu.memory_space<vmem>>, vector<8x128xf32>,
    %94 = math.log %89 : vector<8x1xf32>
    %95 = vector.broadcast %94 : vector<8x1xf32> to vector<8x128xf32>
    %96 = arith.subf %86, %95 : vector<8x128xf32>
    %97 = tpu.iota {dimensions = array<i32: 1>} : vector<8x128xi32>
    %98 = vector.broadcast %2 : vector<8x1xi32> to vector<8x128xi32>
    %99 = arith.cmpi eq, %97, %98 : vector<8x128xi32>
    %cst_36 = arith.constant 0.000000e+00 : f32
    %100 = vector.broadcast %cst_36 : f32 to vector<8x128xf32>
    %101 = arith.select %99, %96, %100 : vector<8x128xi1>, vector<8x128xf32>
    %102 = vector.shape_cast %101 : vector<8x128xf32> to vector<1x8x128xf32>
    %cst_37 = arith.constant dense<0.000000e+00> : vector<1xf32>
    %103 = vector.multi_reduction <add>, %102, %cst_37 [1, 2] : vector<1x8x128xf32> to vector<1xf32>
    %104 = vector.shape_cast %103 : vector<1xf32> to vector<1x1x1xf32>
    %105 = vector.extract %104[0, 0, 0] : f32 from vector<1x1x1xf32>
    %cst_38 = arith.constant 0.000000e+00 : f32
    %106 = arith.subf %cst_38, %105 : f32
    %cst_39 = arith.constant 8.000000e+00 : f32
    %107 = arith.divf %106, %cst_39 : f32
    %c0_40 = arith.constant 0 : index
    %c0_41 = arith.constant 0 : index
    %108 = memref.load %arg7[%c0_40, %c0_41] : memref<1x1xf32, #tpu.memory_space<smem>>
    memref.store %107, %arg7[%c0_40, %c0_41] : memref<1x1xf32, #tpu.memory_space<smem>>
    return
  }
}

</mosaic_0001>

<bundles_post_ra>
// kernel: tpu_custom_call.1
= control target key start
LH: loop header
LB: loop body
LE: loop exit
PB: predicated region body
PF: predicated region fallthrough
CT: control target
= control target key end

     0   :  { %13 = vsyncpa [#allocation3], 0  ;;  %v689_v1 = vmov 9   ;;  %v690_v5 = vmov 0.0   ;;  %vm229_vm0 = vcmask 1043456   ;;  %vm691_vm1 = vmmov 0   ;;  %s864_s0 = inlined_call_operand.vmem [shape: f32[8,10], index: 0, kind: input, shape index: {}]   ;;  %s865_s1 = inlined_call_operand.vmem [shape: bf16[256,32], index: 1, kind: input, shape index: {}]   ;;  %s866_s2 = inlined_call_operand.vmem [shape: bf16[9,32], index: 2, kind: input, shape index: {}]   ;;  %s867_s3 = inlined_call_operand.vmem [shape: bf16[32,16], index: 3, kind: input, shape index: {}]   ;;  %s868_s4 = inlined_call_operand.vmem [shape: bf16[16,128], index: 4, kind: input, shape index: {}]   ;;  %s869_s5 = inlined_call_operand.vmem [shape: f32[5,128], index: 5, kind: input, shape index: {}]   ;;  %s870_s6 = inlined_call_operand.hbm [shape: f32[8,128], index: 6, kind: output, shape index: {0}]   ;;  %s871_s7 = inlined_call_operand.hbm [shape: f32[1,1], index: 7, kind: output, shape index: {1}]  }
   0x1   :  { %v28_v0 = vld [vmem:[%s864_s0] sm:$0xff]  ;;  %620 = vset.pattern.permute.xlu0 %v689_v1  ;;  %588 = vmatprep.subr.bf16.mxu1 %v690_v5  ;;  %v625_v7 = vld [vmem:[%s865_s1 + $0x48] sm:$0xff]   ;;  %v627_v9 = vld [vmem:[%s865_s1 + $0x50] sm:$0xff]   ;;  %vm230_vm2 = vcmask 1044480   ;;  %v692_v14 = vmov 65535  }
   0x2   :  { %v608_v2 = vtrunc.f32 %v28_v0  ;;  %v623_v3 = vld [vmem:[%s865_s1 + $0x40] sm:$0xff]   ;;  %v626_v8 = vld [vmem:[%s865_s1 + $0x8] sm:$0xff]   ;;  %v628_v10 = vld [vmem:[%s865_s1 + $0x10] sm:$0xff]   ;;  %590 = vmatprep.mubr.msk.bf16.mxu1 %vm691_vm1, %v690_v5  ;;  %v231_v15 = vsel %vm229_vm0, 4294967295, %v692_v14 }
   0x3   :  { %v624_v4 = vld [vmem:[%s865_s1] sm:$0xff]   ;;  %559 = vmatprep.subr.bf16.mxu0 %v623_v3  ;;  %v629_v11 = vld [vmem:[%s865_s1 + $0x58] sm:$0xff]   ;;  %v232_v17 = vsel %vm230_vm2, %v231_v15, 0  ;;  %v633_v18 = vld [vmem:[%s865_s1 + $0x68] sm:$0xff]  }
   0x4   :  { %v747_v6 = vcvt.f32.s32 %v608_v2  ;;  %560 = vmatpush3.bf16.msra.mxu0 %v624_v4  ;;  %v630_v12 = vld [vmem:[%s865_s1 + $0x18] sm:$0xff]   ;;  %v631_v13 = vld [vmem:[%s865_s1 + $0x60] sm:$0xff]  }
   0x5   :  { %561 = vmatprep.subr.bf16.mxu0 %v625_v7  ;;  %v632_v16 = vld [vmem:[%s865_s1 + $0x20] sm:$0xff]  }
   0x6   :  { %34 = vperm.xlu0 %620, %v747_v6   ;;  %v639_v19 = vld [vmem:[%s866_s2] sm:$0x1f]  }
   0x7   :  { %v234_v20 = vand.u32 %v639_v19, %v232_v17 }
   0x8   :  { %562 = vmatpush3.bf16.msra.mxu0 %v626_v8 }
   0x9   :  { %563 = vmatprep.subr.bf16.mxu0 %v627_v9 }
   0xc   :  { %564 = vmatpush3.bf16.msra.mxu0 %v628_v10 }
   0xd   :  { %565 = vmatprep.subr.bf16.mxu0 %v629_v11 }
  0x10   :  { %566 = vmatpush3.bf16.msra.mxu0 %v630_v12 }
  0x11   :  { %567 = vmatprep.subr.bf16.mxu0 %v631_v13 }
  0x12   :  { %14 = vsyncpa [#allocation4], 0  ;;  %v43_v21 = vpack.c.bf16 %v28_v0, %v28_v0  ;;  %v634_v22 = vld [vmem:[%s865_s1 + $0x28] sm:$0xff]   ;;  %v635_v23 = vld [vmem:[%s865_s1 + $0x70] sm:$0xff]   ;;  %589 = vmatpush3.bf16.msra.mxu1 %v234_v20  ;;  %vm225_vm3 = vcmask 72704   ;;  %v30_v27 = vlaneseq  ;;  %vm276_vm8 = vcmask 261120  }
  0x13   :  { %594 = vmatprep.subr.bf16.mxu1 %v690_v5  ;;  %v636_v24 = vld [vmem:[%s865_s1 + $0x30] sm:$0xff]   ;;  %v637_v25 = vld [vmem:[%s865_s1 + $0x78] sm:$0xff]   ;;  %v693_v31 = vmov 1.0|1.0   ;;  %v640_v32 = vld [vmem:[%s867_s3] sm:$0xff]   ;;  %vm373_vm9 = vcmask 130048  }
  0x14   :  { %568 = vmatpush3.bf16.msra.mxu0 %v632_v16  ;;  %v638_v26 = vld [vmem:[%s865_s1 + $0x38] sm:$0xff]   ;;  %v800_v28 = vand.u32 127, %v30_v27  ;;  %v641_v33 = vld [vmem:[%s867_s3 + $0x8] sm:$0xff]   ;;  %v549_v3 = vld [vmem:[%s869_s5] ss:$0 sm:$0xff] }
  0x15   :  { %569 = vmatprep.subr.bf16.mxu0 %v633_v18  ;;  %591 = vmatmul.mubr.msk.bf16.vlgmr.msra.gmra.mrb[0].mxu1 %vm225_vm3, %v43_v21  ;;  %v550_v7 = vld [vmem:[%s869_s5 + $0x1] ss:$0 sm:$0xff] }
  0x16   :  { %598 = vmatprep.mubr.msk.bf16.mxu1 %vm691_vm1, %v690_v5  ;;  %v32_v29 = vadd.s32 128, %v800_v28  ;;  %595 = vmatpush3.bf16.msra.mxu1 %v640_v32  ;;  %v642_v12 = vld [vmem:[%s868_s4] sm:$0xff]  }
  0x17   :  { %596 = vmatprep.subr.bf16.mxu1 %v690_v5 }
  0x18   :  { %570 = vmatpush3.bf16.msra.mxu0 %v634_v22 }
  0x19   :  { %571 = vmatprep.subr.bf16.mxu0 %v635_v23 }
  0x1a   :  { %597 = vmatpush3.bf16.msra.mxu1 %v641_v33 }
  0x1b   :  { %602 = vmatprep.subr.bf16.mxu1 %v690_v5 }
  0x1c   :  { %572 = vmatpush3.bf16.msra.mxu0 %v636_v24 }
  0x1d   :  { %573 = vmatprep.subr.bf16.mxu0 %v637_v25 }
  0x20   :  { %574 = vmatpush3.bf16.msra.mxu0 %v638_v26 }
  0x85   :  { %v35_v30 = vpop.permute.xlu0 %34 }
  0x86   :  { %vm36_vm4 = vcmp.eq.s32.totalorder %v800_v28, %v35_v30  ;;  %vm37_vm5 = vcmp.eq.s32.totalorder %v32_v29, %v35_v30 }
  0x87   :  { %vm545_vm6 = vmpackc.low %vm36_vm4, %vm36_vm4 }
  0x88   :  { %vm543_vm7 = vmpackc.low %vm37_vm5, %vm37_vm5 }
  0x89   :  { %544 = vmatprep.mubr.msk.bf16.mxu0 %vm543_vm7, %v693_v31 }
  0x8a   :  { %546 = vmatmul.mubr.msk.bf16.vlgmr.msra.gmra.mrb[0].mxu0 %vm545_vm6, %v693_v31 }
  0xe8   :  { %v270_v34 = vpop.f32.mrb[0].mxu1 }
  0xe9   :  { %v592_v35 = vpop.f32.mrb[1].mxu1 }
  0xea   :  { %v273_v36 = vpop.f32.mrb[2].mxu1 }
  0xeb   :  { %v593_v37 = vpop.f32.mrb[3].mxu1 }
 0x15d   :  { %v575_v38 = vpop.f32.mrb[0].mxu0 }
 0x15e   :  { %v576_v39 = vpop.f32.mrb[1].mxu0 }
 0x15f   :  { %v577_v40 = vadd.f32 %v576_v39, %v575_v38  ;;  %v578_v41 = vpop.f32.mrb[2].mxu0 }
 0x160   :  { %v579_v42 = vpop.f32.mrb[3].mxu0 }
 0x161   :  { %v271_v43 = vadd.f32 %v577_v40, %v270_v34  ;;  %v554_v40 = vld [vmem:[%s869_s5 + $0x2] ss:$0 sm:$0xff]  ;;  %v555_v42 = vld [vmem:[%s869_s5 + $0x3] ss:$0 sm:$0xff] }
 0x163   :  { %v286_v44 = vmul.f32 %v271_v43, %v271_v43  ;;  %v277_v45 = vsel %vm276_vm8, %v271_v43, 0.0 }
 0x164   :  { %v278_v46 = vrot.slane %v277_v45, 4 }
 0x165   :  { %v287_v47 = vsel %vm276_vm8, %v286_v44, 0.0 }
 0x166   :  { %v279_v48 = vadd.f32 %v278_v46, %v277_v45  ;;  %v288_v49 = vrot.slane %v287_v47, 4 }
 0x168   :  { %v280_v50 = vrot.slane %v279_v48, 2  ;;  %v289_v51 = vadd.f32 %v288_v49, %v287_v47  ;;  %v556_v47 = vld [vmem:[%s869_s5 + $0x4] ss:$0 sm:$0xff]  ;;  %s695_s5 = smov [#allocation2]  }
 0x169   :  { %s504_s24 = sshll.u32 %s695_s5, 4  ;;  %s505_s24 = int_to_ptr.vmem [resolvable:$true] %s504_s24 }
 0x16a   :  { %v281_v52 = vadd.f32 %v280_v50, %v279_v48  ;;  %v290_v53 = vrot.slane %v289_v51, 2  ;;  %s653_s25 = scalar_lea.vmem %s505_s24, 128  ;;  %p658_p1 = scmp.lt.s32.totalorder %s505_s24, %s505_s24 }
 0x16b   :  { %p654_p0 = scmp.ne.s32.totalorder %s505_s24, %s653_s25  ;;  %p659_p2 = scmp.lt.s32.totalorder %s653_s25, %s653_s25 }
 0x16c   :  { %v282_v54 = vrot.slane %v281_v52, 1  ;;  %v291_v55 = vadd.f32 %v290_v53, %v289_v51  ;;  %v694_v53 = vmov 0  }
 0x16d   :  { %621 = vset.pattern.permute.xlu1 %v694_v53  ;;  %622 = vset.pattern.permute.xlu0 %v694_v53  ;;  %p660_p3 = por %p659_p2, %p658_p1 }
 0x16e   :  { %v283_v56 = vadd.f32 %v282_v54, %v281_v52  ;;  %v292_v57 = vrot.slane %v291_v55, 1 }
 0x16f   :  { %p661_p4 = pnand %p660_p3, %p654_p0 }
 0x170   :  { %v285_v58 = vmul.f32 0.125, %v283_v56  ;;  %v293_v59 = vadd.f32 %v292_v57, %v291_v55 }
 0x172   :  { %v294_v60 = vmul.f32 0.125, %v293_v59  ;;  %v295_v61 = vmul.f32 %v285_v58, %v285_v58  ;;  %v298_v1 = vsub.f32 %v271_v43, %v285_v58 }
 0x174   :  { %v296_v62 = vsub.f32 %v294_v60, %v295_v61 }
 0x176   :  { %v297_v63 = vmax.f32 %v296_v62, 0.0 }
 0x178   :  { %v299_v0 = vadd.f32 1e-05, %v297_v63 }
 0x17a   :  { %643 = vrsqrt.f32 %v299_v0 }
 0x184   :  { %v644_v2 = vpop.eup %643 }
 0x185   :  { %v301_v4 = vmul.f32 %v644_v2, %v298_v1 }
 0x187   :  { %v306_v8 = vmul.f32 %v549_v3, %v301_v4 }
 0x189   :  { %v311_v9 = vadd.f32 %v550_v7, %v306_v8 }
 0x18b   :  { %v312_v10 = vmax.f32 %v311_v9, 0.0 }
 0x18d   :  { %v313_v11 = vpack.c.bf16 %v312_v10, %v312_v10 }
 0x18f   :  { %599 = vmatmul.mubr.msk.bf16.vlgmr.msra.gmra.mrb[4].mxu1 %vm276_vm8, %v313_v11 }
 0x190   :  { %604 = vmatprep.mubr.msk.bf16.mxu1 %vm691_vm1, %v690_v5  ;;  %603 = vmatpush3.bf16.msra.mxu1 %v642_v12 }
 0x262   :  { %v367_v13 = vpop.f32.mrb[4].mxu1 }
 0x263   :  { %v374_v14 = vsel %vm373_vm9, %v367_v13, 0.0  ;;  %v382_v15 = vmul.f32 %v367_v13, %v367_v13  ;;  %v600_v16 = vpop.f32.mrb[5].mxu1 }
 0x264   :  { %v375_v17 = vrot.slane %v374_v14, 4  ;;  %v370_v18 = vpop.f32.mrb[6].mxu1 }
 0x265   :  { %v383_v19 = vsel %vm373_vm9, %v382_v15, 0.0  ;;  %v601_v20 = vpop.f32.mrb[7].mxu1 }
 0x266   :  { %v376_v21 = vadd.f32 %v375_v17, %v374_v14  ;;  %v384_v22 = vrot.slane %v383_v19, 4 }
 0x268   :  { %v377_v23 = vrot.slane %v376_v21, 2  ;;  %v385_v5 = vadd.f32 %v384_v22, %v383_v19 }
 0x26a   :  { %v378_v24 = vadd.f32 %v377_v23, %v376_v21  ;;  %v386_v25 = vrot.slane %v385_v5, 2 }
 0x26c   :  { %v379_v26 = vrot.slane %v378_v24, 1  ;;  %v387_v27 = vadd.f32 %v386_v25, %v385_v5 }
 0x26e   :  { %v380_v29 = vadd.f32 %v379_v26, %v378_v24  ;;  %v388_v30 = vrot.slane %v387_v27, 1 }
 0x270   :  { %v381_v31 = vmul.f32 0.125, %v380_v29  ;;  %v389_v32 = vadd.f32 %v388_v30, %v387_v27 }
 0x272   :  { %v390_v33 = vmul.f32 0.125, %v389_v32  ;;  %v391_v34 = vmul.f32 %v381_v31, %v381_v31  ;;  %v394_v38 = vsub.f32 %v367_v13, %v381_v31 }
 0x274   :  { %v392_v35 = vsub.f32 %v390_v33, %v391_v34 }
 0x276   :  { %v393_v36 = vmax.f32 %v392_v35, 0.0 }
 0x278   :  { %v395_v37 = vadd.f32 1e-05, %v393_v36 }
 0x27a   :  { %645 = vrsqrt.f32 %v395_v37 }
 0x284   :  { %v646_v39 = vpop.eup %645 }
 0x285   :  { %v397_v41 = vmul.f32 %v646_v39, %v394_v38 }
 0x287   :  { %v402_v43 = vmul.f32 %v554_v40, %v397_v41 }
 0x289   :  { %v407_v44 = vadd.f32 %v555_v42, %v402_v43 }
 0x28b   :  { %v408_v45 = vmax.f32 %v407_v44, 0.0 }
 0x28d   :  { %v409_v46 = vpack.c.bf16 %v408_v45, %v408_v45 }
 0x28f   :  { %605 = vmatmul.mubr.msk.bf16.vlgmr.msra.gmra.mrb[8].mxu1 %vm373_vm9, %v409_v46 }
 0x362   :  { %v459_v48 = vpop.f32.mrb[8].mxu1 }
 0x363   :  { %v460_v49 = vadd.f32 %v556_v47, %v459_v48  ;;  %v606_v50 = vpop.f32.mrb[9].mxu1 }
 0x364   :  { %v462_v51 = vpop.f32.mrb[10].mxu1 }
 0x365   :  { %465 = vmax.xlane.f32.xlu0 %v460_v49  ;;  %v607_v52 = vpop.f32.mrb[11].mxu1 }
 0x3f2   :  { %v466_v54 = vpop.xlane.xlu0 %465 }
 0x3f3   :  { %v467_v55 = vsub.f32 %v460_v49, %v466_v54 }
 0x3f5   :  { %v468_v56 = vmul.f32 1.442695, %v467_v55 }
 0x3f7   :  { %647 = vpow2.f32 %v468_v56 }
 0x401   :  { %v648_v57 = vpop.eup %647 }
 0x402   :  { %470 = vadd.xlane.f32.xlu1 %v648_v57 }
 0x413   :  { %479 = vperm.xlu1 %621, %v747_v6  }
 0x48f   :  { %v471_v58 = vpop.xlane.xlu1 %470 }
 0x490   :  { %649 = vrcp.f32 %v471_v58 }
 0x491   :  { %651 = vlog2.f32 %v471_v58 }
 0x493   :  { %v480_v60 = vpop.permute.xlu1 %479 }
 0x494   :  { %vm481_vm10 = vcmp.eq.s32.totalorder %v800_v28, %v480_v60 }
 0x49a   :  { %v650_v59 = vpop.eup %649 }
 0x49b   :  { %v652_v61 = vpop.eup %651  ;;  %v473_v62 = vmul.f32 %v650_v59, %v648_v57 }
 0x49c   :  { %v476_v63 = vmul.f32 0.6931472, %v652_v61 }
 0x49d   :  { %474 = vst [vmem:[#allocation2] sm:$0xff] %v473_v62 }
 0x49e   :  { %v477_v0 = vsub.f32 %v467_v55, %v476_v63 }
 0x4a0   :  { %v482_v1 = vsel %vm481_vm10, %v477_v0, 0.0 }
 0x4a1   :  { %483 = vadd.xlane.f32.xlu1 %v482_v1 }
 0x4a2   :  { %664 = shalt.err (!%p661_p4)
}
 0x4a3   :  { %s665_s28 = scalar_lea.hbm %s870_s6, 128 }
 0x4a4   :  { %p666_p5 = scmp.ne.s32.totalorder %s870_s6, %s665_s28  ;;  %p669_p6 = scmp.lt.u32.totalorder %s665_s28, %s870_s6 }
 0x4a6   :  { %p671_p7 = pnand %p669_p6, %p666_p5 }
 0x4a8   :  { %674 = shalt.err (!%p671_p7)
}
 0x4a9   :  { %507 = dma.vmem_to_hbm [thread:$0]  %s505_s24, 128, %s870_s6, [#allocation3]  }
 0x4aa   :  { %s675_s3 = scalar_lea.hbm %s871_s7, 16 }
 0x4ab   :  { %p676_p8 = scmp.ne.s32.totalorder %s871_s7, %s675_s3  ;;  %p679_p9 = scmp.lt.u32.totalorder %s675_s3, %s871_s7 }
 0x4ad   :  { %p681_p10 = pnand %p679_p9, %p676_p8 }
 0x52e   :  { %v484_v6 = vpop.xlane.xlu1 %483 }
 0x52f   :  { %v485_v28 = vrot.slane %v484_v6, 4 }
 0x531   :  { %v486_v2 = vadd.f32 %v485_v28, %v484_v6 }
 0x533   :  { %v487_v3 = vrot.slane %v486_v2, 2 }
 0x535   :  { %v488_v4 = vadd.f32 %v487_v3, %v486_v2 }
 0x537   :  { %v489_v7 = vrot.slane %v488_v4, 1 }
 0x539   :  { %v490_v8 = vadd.f32 %v489_v7, %v488_v4 }
 0x53b   :  { %610 = vpush %v490_v8 }
 0x56c   :  { %s611_s10 = spop %610 }
 0x56d   :  { %s492_s11 = ssub.f32 0.0, %s611_s10 }
 0x56f   :  { %s495_s12 = smul.f32 0.125, %s492_s11 }
 0x571   :  { %497 = sst [smem:[#allocation5]] %s495_s12 }
 0x572   :  { %684 = shalt.err (!%p681_p10)
}
 0x573   :  { %s696_s17 = smov [#allocation5]  }
 0x574   :  { %515 = dma.smem_to_hbm %s696_s17, 16, %s871_s7, [#allocation4]  }
 0x575   :  { %685 = dma.done.wait [#allocation3], 128  }
 0x576   :  { %686 = vsyncadd [#allocation3], 4294967168 }
 0x577   :  { %687 = dma.done.wait [#allocation4], 16  }
 0x578   :  { %688 = vsyncadd [#allocation4], 4294967280 }
 0x579   :  { %522 = sfence }
 0x57a   :  { %523 = vsyncpa [#allocation3], 1 }
 0x57b   :  { %524 = vsyncpa [#allocation4], 1 }

</bundles_post_ra>
